<compile_context>
chip_gen: v7x
topology: tpu7x:2x2x1
jax: 0.10.0
libtpu: 0.0.40
codegen_flags: <defaults>
</compile_context>

<pallas_src>
import jax
import jax.numpy as jnp
from jax.experimental import pallas as pl
from jax.experimental.pallas import tpu as pltpu


# --------------------------------------------------------------------------- helpers
def _round_up(v: int, m: int) -> int:
    return ((v + m - 1) // m) * m


def _device_kind() -> str:
    try:
        return jax.devices()[0].device_kind.lower()
    except Exception:
        return ""


def _vmem_capacity_bytes() -> int:
    """Physical VMEM per core. Prefer get_tpu_info, then device_kind, then conservative."""
    try:
        cap = int(pltpu.get_tpu_info().vmem_capacity_bytes)
        if cap > 0:
            return cap
    except Exception:
        pass
    kind = _device_kind()
    if "v7" in kind:
        return 64 * 1024 * 1024
    if kind:                       # v4 / v5e / v5p / v6e: 128 MiB per core
        return 128 * 1024 * 1024
    return 64 * 1024 * 1024        # unknown backend: conservative


def _num_tensorcores() -> int:
    kind = _device_kind()
    if "v7" in kind:
        return 2
    if ("v4" in kind or "v5p" in kind) and "lite" not in kind:
        return 2                   # megacore
    return 1


def _plan_tiles(n_pad, k_pad, b_pad, num_members, w_itemsize, x_itemsize,
                budget_bytes, min_n_tiles):
    """Pick (tn, member_block, weight_buffer_count) fitting the VMEM budget.

    Preference: largest lane tile TN (contiguous weight DMAs), then largest
    member block MB (amortizes per-grid-step overhead + accumulator RMW),
    then a 3rd weight pipeline buffer if it still fits.
    """
    def working_set(tn, mb, bufs):
        return (bufs * mb * k_pad * tn * w_itemsize   # streamed weight tiles
                + k_pad * tn * 4                      # f32 weight-sum accumulator
                + 2 * b_pad * tn * 4                  # output tile (f32 upper bound)
                + 2 * b_pad * k_pad * x_itemsize      # resident x tile (2 bufs)
                + 2 * tn * 4)                         # bias tile

    if min_n_tiles > 1:
        tn_cap = max(128, (n_pad // min_n_tiles) // 128 * 128)
    else:
        tn_cap = n_pad
    tn_candidates = sorted(
        (t for t in range(128, n_pad + 1, 128) if n_pad % t == 0 and t <= tn_cap),
        reverse=True)
    if not tn_candidates:
        tn_candidates = [128]

    for tn in tn_candidates:
        if working_set(tn, 1, 2) > budget_bytes:
            continue
        mb = 1
        while mb < num_members and working_set(tn, mb + 1, 2) <= budget_bytes:
            mb += 1
        bufs = 3 if working_set(tn, mb, 3) <= budget_bytes else 2
        return tn, mb, bufs

    raise ValueError(
        "EnsembleModel kernel working set does not fit in VMEM even at the "
        f"smallest tile (tn=128, MB=1): k_pad={k_pad}, b_pad={b_pad}, "
        f"budget={budget_bytes} bytes. "
        "TODO(synk): add a K (D_in) / B reduction grid axis for such shapes.")


# --------------------------------------------------------------------------- kernel
def _make_ensemble_kernel(inv_m: float):
    def ensemble_kernel(x_ref, w_ref, b_ref, o_ref, w_acc_ref):
        # grid = (n_out_tiles, member_groups); axis 1 is the reduction axis.
        g = pl.program_id(1)

        # Reduce MB member tiles in vregs, pre-scaled by 1/M (VPU has slack
        # while HBM-bound); one accumulator load/store per group, not per member.
        partial = jnp.sum(w_ref[...].astype(jnp.float32), axis=0) * inv_m

        @pl.when(g == 0)
        def _():
            w_acc_ref[...] = partial

        @pl.when(g > 0)
        def _():
            w_acc_ref[...] += partial

        @pl.when(g == pl.num_programs(1) - 1)
        def _():
            # Single MXU pass per output tile, in the streamed dtype
            # (bf16 x bf16 when inputs are bf16; f32 otherwise).
            w_mean = w_acc_ref[...].astype(x_ref.dtype)
            y = jnp.dot(x_ref[...], w_mean, preferred_element_type=jnp.float32)
            o_ref[...] = (y + b_ref[...]).astype(o_ref.dtype)

    return ensemble_kernel


# --------------------------------------------------------------------------- wrapper
def ensemble_forward(x, w_stacked, b_stacked):
    """x: (B, D_in); w_stacked: (M, D_in, D_out); b_stacked: (M, D_out)."""
    B, D_in = x.shape
    M, D_in_w, D_out = w_stacked.shape
    assert D_in_w == D_in and b_stacked.shape == (M, D_out)

    out_dtype = x.dtype
    x_itemsize = jnp.dtype(x.dtype).itemsize
    w_itemsize = jnp.dtype(w_stacked.dtype).itemsize

    # dtype-correct sublane multiples: f32 -> 8, bf16 -> 16, int8/fp8 -> 32.
    sub_x = max(8, 32 // x_itemsize)
    sub_w = max(8, 32 // w_itemsize)
    b_pad = _round_up(B, sub_x)
    k_pad = _round_up(D_in, max(sub_x, sub_w))
    n_pad = _round_up(D_out, 128)

    vmem_cap = _vmem_capacity_bytes()
    num_cores = _num_tensorcores()
    # Keep >= 2 output tiles on multi-core chips so the "parallel" axis feeds
    # both TensorCores (only when D_out is wide enough to split).
    min_n_tiles = 2 if (num_cores >= 2 and n_pad >= 256) else 1

    budget = int(vmem_cap * 0.60)
    tn, mb, w_bufs = _plan_tiles(n_pad, k_pad, b_pad, M, w_itemsize, x_itemsize,
                                 budget, min_n_tiles)
    n_tiles = n_pad // tn
    m_pad = _round_up(M, mb)          # zero-padded members contribute nothing
    m_groups = m_pad // mb

    x_p = jnp.pad(x, ((0, b_pad - B), (0, k_pad - D_in)))
    w_p = jnp.pad(w_stacked,
                  ((0, m_pad - M), (0, k_pad - D_in), (0, n_pad - D_out)))
    # Bias mean is tiny: reduce once here, add once inside the final grid step.
    b_mean = jnp.mean(b_stacked.astype(jnp.float32), axis=0)
    b_mean = jnp.pad(b_mean, (0, n_pad - D_out)).reshape(1, n_pad)

    cost = pl.CostEstimate(
        flops=int(2 * b_pad * k_pad * n_pad + m_pad * k_pad * n_pad),
        transcendentals=0,
        bytes_accessed=int(m_pad * k_pad * n_pad * w_itemsize     # weight stream
                           + b_pad * k_pad * x_itemsize
                           + n_pad * 4
                           + b_pad * n_pad * jnp.dtype(out_dtype).itemsize),
    )

    def _x_map(n, g):
        return (0, 0)

    def _w_map(n, g):
        return (g, 0, n)

    def _n_map(n, g):
        return (0, n)

    def _run(bufs):
        if bufs == 2:
            w_spec = pl.BlockSpec((mb, k_pad, tn), _w_map)
        else:
            # Extra weight buffer keeps the DMA engine streaming the next tile
            # underneath the final-step MXU matmul.
            w_spec = pl.BlockSpec((mb, k_pad, tn), _w_map,
                                  pipeline_mode=pl.Buffered(bufs))
        return pl.pallas_call(
            _make_ensemble_kernel(1.0 / float(M)),
            out_shape=jax.ShapeDtypeStruct((b_pad, n_pad), out_dtype),
            grid_spec=pltpu.PrefetchScalarGridSpec(
                num_scalar_prefetch=0,
                grid=(n_tiles, m_groups),   # (parallel out-tiles, arbitrary members)
                in_specs=[
                    pl.BlockSpec((b_pad, k_pad), _x_map),   # x: resident
                    w_spec,                                  # W member-block stream
                    pl.BlockSpec((1, tn), _n_map),           # pre-averaged bias
                ],
                out_specs=pl.BlockSpec((b_pad, tn), _n_map),
                scratch_shapes=[pltpu.VMEM((k_pad, tn), jnp.float32)],  # weight-sum acc
            ),
            compiler_params=pltpu.CompilerParams(
                dimension_semantics=("parallel", "arbitrary"),
                vmem_limit_bytes=int(vmem_cap * 0.80),
            ),
            cost_estimate=cost,
        )(x_p, w_p, b_mean)

    try:
        out = _run(w_bufs)
    except Exception:
        if w_bufs == 2:
            raise
        out = _run(2)   # fall back to default double-buffering

    return out[:B, :D_out]


# --------------------------------------------------------------------------- reference
def reference_forward(x, w_stacked, b_stacked):
    # Pure-JAX mirror of torch.stack([m(x) for m in models]).mean(dim=0)
    outs = jnp.einsum("bi,mio->mbo", x, w_stacked,
                      precision=jax.lax.Precision.HIGHEST) + b_stacked[:, None, :]
    return jnp.mean(outs, axis=0)


# --------------------------------------------------------------------------- main
if __name__ == "__main__":
    key = jax.random.PRNGKey(0)
    k1, k2, k3, k4, k5, k6 = jax.random.split(key, 6)

    # 1) Small shapes consistent with the module: batch=8, d_in=32, d_out=64, M=4.
    B, D_IN, D_OUT, M = 8, 32, 64, 4
    x = jax.random.normal(k1, (B, D_IN), dtype=jnp.float32)
    w = jax.random.normal(k2, (M, D_IN, D_OUT), dtype=jnp.float32) * 0.05
    b = jax.random.normal(k3, (M, D_OUT), dtype=jnp.float32) * 0.05

    out = jax.block_until_ready(ensemble_forward(x, w, b))
    ref = reference_forward(x, w, b)
    assert out.shape == (B, D_OUT)
    assert jnp.allclose(out, ref, atol=1e-4, rtol=1e-4), "f32 mismatch vs JAX reference"

    # 2) Padding / multi-out-tile / member-padding path (unaligned B, D_in, D_out, M=3).
    B2, D_IN2, D_OUT2, M2 = 5, 40, 200, 3
    x2 = jax.random.normal(k4, (B2, D_IN2), dtype=jnp.float32)
    w2 = jax.random.normal(k5, (M2, D_IN2, D_OUT2), dtype=jnp.float32) * 0.05
    b2 = jax.random.normal(k6, (M2, D_OUT2), dtype=jnp.float32) * 0.05
    out2 = jax.block_until_ready(ensemble_forward(x2, w2, b2))
    ref2 = reference_forward(x2, w2, b2)
    assert out2.shape == (B2, D_OUT2)
    assert jnp.allclose(out2, ref2, atol=1e-4, rtol=1e-4), "padded-path mismatch"

    # 3) bf16 streaming path (half the HBM weight traffic; f32 accumulation,
    #    bf16 operands into the final MXU matmul).
    out_bf = jax.block_until_ready(
        ensemble_forward(x.astype(jnp.bfloat16), w.astype(jnp.bfloat16),
                         b.astype(jnp.bfloat16)))
    ref_bf = reference_forward(x.astype(jnp.bfloat16).astype(jnp.float32),
                               w.astype(jnp.bfloat16).astype(jnp.float32),
                               b.astype(jnp.bfloat16).astype(jnp.float32))
    assert out_bf.shape == (B, D_OUT)
    assert jnp.allclose(out_bf.astype(jnp.float32), ref_bf, atol=3e-2, rtol=3e-2), \
        "bf16 mismatch vs JAX reference"

    print("KERNEL_OK")
</pallas_src>

<mosaic_0001>
module attributes {stable_mosaic.version = 11 : i64} {
  func.func @ensemble_kernel(%arg0: i32, %arg1: i32, %arg2: memref<8x32xf32, #tpu.memory_space<vmem>>, %arg3: memref<4x32x128xf32, #tpu.memory_space<vmem>>, %arg4: memref<1x128xf32, #tpu.memory_space<vmem>>, %arg5: memref<8x128xf32, #tpu.memory_space<vmem>>, %arg6: memref<32x128xf32, #tpu.memory_space<vmem>>) attributes {dimension_semantics = [#tpu.dimension_semantics<parallel>, #tpu.dimension_semantics<arbitrary>], iteration_bounds = array<i64: 1, 1>, scalar_prefetch = 0 : i64, scratch_operands = 1 : i64, tpu.core_type = #tpu.core_type<tc>, window_params = [{pipeline_mode = #tpu.pipeline_mode<synchronous>, transform_indices = @transform_0, window_bounds = array<i64: 8, 32>}, {transform_indices = @transform_1, window_bounds = array<i64: 4, 32, 128>}, {transform_indices = @transform_2, window_bounds = array<i64: 1, 128>}, {transform_indices = @transform_3, window_bounds = array<i64: 8, 128>}]} {
    %c0 = arith.constant 0 : index
    %c0_0 = arith.constant 0 : index
    %c0_1 = arith.constant 0 : index
    %0 = vector.load %arg3[%c0, %c0_0, %c0_1] : memref<4x32x128xf32, #tpu.memory_space<vmem>>, vector<4x32x128xf32>
    %cst = arith.constant dense<0.000000e+00> : vector<32x128xf32>
    %1 = vector.multi_reduction <add>, %0, %cst [0] : vector<4x32x128xf32> to vector<32x128xf32>
    %cst_2 = arith.constant 2.500000e-01 : f32
    %2 = vector.broadcast %cst_2 : f32 to vector<32x128xf32>
    %3 = arith.mulf %1, %2 : vector<32x128xf32>
    %c0_i32 = arith.constant 0 : i32
    %4 = arith.cmpi eq, %arg1, %c0_i32 : i32
    %5 = arith.extui %4 : i1 to i32
    %c0_i32_3 = arith.constant 0 : i32
    %6 = arith.cmpi ne, %5, %c0_i32_3 : i32
    scf.if %6 {
      %c0_8 = arith.constant 0 : index
      %c0_9 = arith.constant 0 : index
      %13 = vector.load %arg6[%c0_8, %c0_9] : memref<32x128xf32, #tpu.memory_space<vmem>>, vector<32x128xf32>
      tpu.vector_store %arg6[%c0_8, %c0_9], %3 {strides = array<i32>} : memref<32x128xf32, #tpu.memory_space<vmem>>, vector<32x128xf32>,
    } else {
    }
    %c0_i32_4 = arith.constant 0 : i32
    %7 = arith.cmpi sgt, %arg1, %c0_i32_4 : i32
    %8 = arith.extui %7 : i1 to i32
    %c0_i32_5 = arith.constant 0 : i32
    %9 = arith.cmpi ne, %8, %c0_i32_5 : i32
    scf.if %9 {
      %c0_8 = arith.constant 0 : index
      %c0_9 = arith.constant 0 : index
      %13 = vector.load %arg6[%c0_8, %c0_9] : memref<32x128xf32, #tpu.memory_space<vmem>>, vector<32x128xf32>
      %14 = arith.addf %13, %3 : vector<32x128xf32>
      %c0_10 = arith.constant 0 : index
      %c0_11 = arith.constant 0 : index
      %15 = vector.load %arg6[%c0_10, %c0_11] : memref<32x128xf32, #tpu.memory_space<vmem>>, vector<32x128xf32>
      tpu.vector_store %arg6[%c0_10, %c0_11], %14 {strides = array<i32>} : memref<32x128xf32, #tpu.memory_space<vmem>>, vector<32x128xf32>,
    } else {
    }
    %c0_i32_6 = arith.constant 0 : i32
    %10 = arith.cmpi eq, %arg1, %c0_i32_6 : i32
    %11 = arith.extui %10 : i1 to i32
    %c0_i32_7 = arith.constant 0 : i32
    %12 = arith.cmpi ne, %11, %c0_i32_7 : i32
    scf.if %12 {
      %c0_8 = arith.constant 0 : index
      %c0_9 = arith.constant 0 : index
      %13 = vector.load %arg6[%c0_8, %c0_9] : memref<32x128xf32, #tpu.memory_space<vmem>>, vector<32x128xf32>
      %c0_10 = arith.constant 0 : index
      %c0_11 = arith.constant 0 : index
      %14 = vector.load %arg2[%c0_10, %c0_11] : memref<8x32xf32, #tpu.memory_space<vmem>>, vector<8x32xf32>
      %cst_12 = arith.constant dense<0.000000e+00> : vector<8x128xf32>
      %15 = tpu.matmul %14, %13, %cst_12 {dimension_numbers = #tpu.dot_dimension_numbers<[1], [0], [0], [1], [0, 0, 1, 1], [], []>} : vector<8x32xf32>, vector<32x128xf32>, vector<8x128xf32> -> vector<8x128xf32>
      %c0_13 = arith.constant 0 : index
      %c0_14 = arith.constant 0 : index
      %16 = vector.load %arg4[%c0_13, %c0_14] : memref<1x128xf32, #tpu.memory_space<vmem>>, vector<1x128xf32>
      %17 = vector.broadcast %16 : vector<1x128xf32> to vector<8x128xf32>
      %18 = arith.addf %15, %17 : vector<8x128xf32>
      %c0_15 = arith.constant 0 : index
      %c0_16 = arith.constant 0 : index
      %19 = vector.load %arg5[%c0_15, %c0_16] : memref<8x128xf32, #tpu.memory_space<vmem>>, vector<8x128xf32>
      tpu.vector_store %arg5[%c0_15, %c0_16], %18 {strides = array<i32>} : memref<8x128xf32, #tpu.memory_space<vmem>>, vector<8x128xf32>,
    } else {
    }
    return
  }
  func.func @transform_0(%arg0: i32, %arg1: i32) -> (i32, i32) {
    %c0_i32 = arith.constant 0 : i32
    %c0_i32_0 = arith.constant 0 : i32
    %c0_i32_1 = arith.constant 0 : i32
    return %c0_i32, %c0_i32_0 : i32, i32
  }
  func.func @transform_1(%arg0: i32, %arg1: i32) -> (i32, i32, i32) {
    %c0_i32 = arith.constant 0 : i32
    %c0_i32_0 = arith.constant 0 : i32
    return %arg1, %c0_i32, %arg0 : i32, i32, i32
  }
  func.func @transform_2(%arg0: i32, %arg1: i32) -> (i32, i32) {
    %c0_i32 = arith.constant 0 : i32
    %c0_i32_0 = arith.constant 0 : i32
    return %c0_i32, %arg0 : i32, i32
  }
  func.func @transform_3(%arg0: i32, %arg1: i32) -> (i32, i32) {
    %c0_i32 = arith.constant 0 : i32
    %c0_i32_0 = arith.constant 0 : i32
    return %c0_i32, %arg0 : i32, i32
  }
}

</mosaic_0001>

<bundles_post_ra>
// kernel: tpu_custom_call.1
= control target key start
LH: loop header
LB: loop body
LE: loop exit
PB: predicated region body
PF: predicated region fallthrough
CT: control target
= control target key end

     0   :  { %8 = vsyncpa [#allocation4], 0  ;;  %s418_s0 = inlined_call_operand.hbm [shape: f32[8,32], index: 0, kind: input, shape index: {}]   ;;  %s419_s1 = inlined_call_operand.hbm [shape: f32[4,32,128], index: 1, kind: input, shape index: {}]   ;;  %s420_s2 = inlined_call_operand.hbm [shape: f32[1,128], index: 2, kind: input, shape index: {}]   ;;  %s421_s3 = inlined_call_operand.hbm [shape: f32[8,128], index: 3, kind: output, shape index: {}]  }
   0x1   :  { %9 = vsyncpa [#allocation7], 0 }
   0x2   :  { %10 = vsyncpa [#allocation5], 0  ;;  %s341_s12 = smov [#allocation6]   ;;  %s247_s16 = scalar_lea.hbm %s419_s1, 2048 }
   0x3   :  { %s26_s13 = sshll.u32 %s341_s12, 4  ;;  %p248_p0 = scmp.ne.s32.totalorder %s419_s1, %s247_s16  ;;  %s27_s13 = int_to_ptr.vmem [resolvable:$true] %s26_s13 }
   0x4   :  { %p251_p1 = scmp.lt.u32.totalorder %s247_s16, %s419_s1 }
   0x6   :  { %p253_p2 = pnand %p251_p1, %p248_p0 }
   0x8   :  { %256 = shalt.err (!%p253_p2)
}
   0x9   :  { %s257_s21 = scalar_lea.vmem %s27_s13, 2048  ;;  %p262_p4 = scmp.lt.s32.totalorder %s27_s13, %s27_s13 }
   0xa   :  { %p258_p3 = scmp.ne.s32.totalorder %s27_s13, %s257_s21  ;;  %p263_p5 = scmp.lt.s32.totalorder %s257_s21, %s257_s21 }
   0xc   :  { %p264_p6 = por %p263_p5, %p262_p4 }
   0xe   :  { %p265_p7 = pnand %p264_p6, %p258_p3 }
  0x10   :  { %268 = shalt.err (!%p265_p7)
}
  0x11   :  { %s342_s22 = smov 128   ;;  %s343_s23 = smov 8  }
  0x12   :  { %32 = dma.hbm_to_vmem [thread:$0]  %s419_s1, 2048, %s27_s13, [#allocation7], %s342_s22, %s342_s22, %s343_s23  }
  0x13   :  { %s344_s26 = smov [#allocation3]   ;;  %s345_s28 = smov [#allocation8]  }
  0x14   :  { %s17_s27 = sshll.u32 %s344_s26, 4  ;;  %s39_s29 = sshll.u32 %s345_s28, 4  ;;  %s18_s27 = int_to_ptr.vmem [resolvable:$true] %s17_s27  ;;  %s40_s29 = int_to_ptr.vmem [resolvable:$true] %s39_s29 }
  0x15   :  { %s269_s5 = scalar_lea.hbm %s418_s0, 128 }
  0x16   :  { %p270_p8 = scmp.ne.s32.totalorder %s418_s0, %s269_s5  ;;  %p273_p9 = scmp.lt.u32.totalorder %s269_s5, %s418_s0 }
  0x18   :  { %p275_p10 = pnand %p273_p9, %p270_p8 }
  0x1a   :  { %278 = shalt.err (!%p275_p10)
}
  0x1b   :  { %s279_s1 = scalar_lea.vmem %s18_s27, 128  ;;  %p284_p12 = scmp.lt.s32.totalorder %s18_s27, %s18_s27 }
  0x1c   :  { %p280_p11 = scmp.ne.s32.totalorder %s18_s27, %s279_s1  ;;  %p285_p13 = scmp.lt.s32.totalorder %s279_s1, %s279_s1 }
  0x1e   :  { %p286_p0 = por %p285_p13, %p284_p12 }
  0x20   :  { %p287_p1 = pnand %p286_p0, %p280_p11 }
  0x22   :  { %290 = shalt.err (!%p287_p1)
}
  0x23   :  { %20 = dma.hbm_to_vmem [thread:$0]  %s418_s0, 128, %s18_s27, [#allocation4]  }
  0x24   :  { %s291_s14 = scalar_lea.hbm %s420_s2, 16 }
  0x25   :  { %p292_p2 = scmp.ne.s32.totalorder %s420_s2, %s291_s14  ;;  %p295_p3 = scmp.lt.u32.totalorder %s291_s14, %s420_s2 }
  0x27   :  { %p297_p4 = pnand %p295_p3, %p292_p2 }
  0x29   :  { %300 = shalt.err (!%p297_p4)
}
  0x2a   :  { %s301_s19 = scalar_lea.vmem %s40_s29, 16  ;;  %s305_s20 = scalar_lea.vmem %s40_s29, 32 }
  0x2b   :  { %p302_p5 = scmp.ne.s32.totalorder %s40_s29, %s301_s19  ;;  %p306_p6 = scmp.lt.s32.totalorder %s40_s29, %s40_s29 }
  0x2c   :  { %p307_p7 = scmp.lt.s32.totalorder %s305_s20, %s301_s19 }
  0x2e   :  { %p308_p8 = por %p307_p7, %p306_p6 }
  0x30   :  { %p309_p9 = pnand %p308_p8, %p302_p5 }
  0x32   :  { %312 = shalt.err (!%p309_p9)
}
  0x33   :  { %42 = dma.hbm_to_vmem [thread:$0]  %s420_s2, 16, %s40_s29, [#allocation7]  }
  0x34   :  { %335 = dma.done.wait [#allocation4], 128  }
  0x35   :  { %336 = vsyncadd [#allocation4], 4294967168 }
  0x36   :  { %337 = dma.done.wait [#allocation7], 2064  }
  0x37   :  { %338 = vsyncadd [#allocation7], 4294965232  ;;  %v346_v0 = vmov 0.0|0.0   ;;  %vm347_vm0 = vmmov 0   ;;  %v348_v1 = vmov 0.0   ;;  %v52_v2 = vld [vmem:[#allocation6] sm:$0xff] }
  0x38   :  { %232 = vmatprep.subr.bf16.mxu0 %v346_v0  ;;  %229 = vmatprep.mubr.msk.f32.mxu0 %vm347_vm0, %v348_v1  ;;  %v53_v3 = vld [vmem:[#allocation6 + $0x8] sm:$0xff]  ;;  %v56_v4 = vld [vmem:[#allocation6 + $0x20] sm:$0xff]  ;;  %v54_v12 = vld [vmem:[#allocation6 + $0x10] sm:$0xff]  ;;  %vm123_vm1 = vcmask 261120   ;;  %s349_s2 = smov [#allocation9]  }
  0x39   :  { %v57_v5 = vld [vmem:[#allocation6 + $0x28] sm:$0xff]  ;;  %v60_v6 = vld [vmem:[#allocation6 + $0x40] sm:$0xff]  ;;  %v68_v8 = vadd.f32 %v56_v4, %v52_v2  ;;  %v55_v14 = vld [vmem:[#allocation6 + $0x18] sm:$0xff]  ;;  %s204_s22 = sshll.u32 %s349_s2, 4  ;;  %s205_s22 = int_to_ptr.vmem [resolvable:$true] %s204_s22 }
  0x3a   :  { %v61_v7 = vld [vmem:[#allocation6 + $0x48] sm:$0xff]  ;;  %v64_v9 = vld [vmem:[#allocation6 + $0x60] sm:$0xff]  ;;  %v71_v11 = vadd.f32 %v57_v5, %v53_v3  ;;  %v58_v15 = vld [vmem:[#allocation6 + $0x30] sm:$0xff]  ;;  %s313_s23 = scalar_lea.vmem %s205_s22, 128  ;;  %p318_p11 = scmp.lt.s32.totalorder %s205_s22, %s205_s22 }
  0x3b   :  { %v65_v10 = vld [vmem:[#allocation6 + $0x68] sm:$0xff]  ;;  %v69_v13 = vadd.f32 %v68_v8, %v60_v6  ;;  %v59_v16 = vld [vmem:[#allocation6 + $0x38] sm:$0xff]  ;;  %v62_v18 = vld [vmem:[#allocation6 + $0x50] sm:$0xff]  ;;  %v74_v20 = vadd.f32 %v58_v15, %v54_v12  ;;  %p314_p10 = scmp.ne.s32.totalorder %s205_s22, %s313_s23  ;;  %p319_p12 = scmp.lt.s32.totalorder %s313_s23, %s313_s23 }
  0x3c   :  { %v72_v17 = vadd.f32 %v71_v11, %v61_v7  ;;  %v63_v19 = vld [vmem:[#allocation6 + $0x58] sm:$0xff]  ;;  %v77_v21 = vadd.f32 %v59_v16, %v55_v14  ;;  %v66_v23 = vld [vmem:[#allocation6 + $0x70] sm:$0xff]  ;;  %v214_v37 = vld [vmem:[#allocation8] ss:$0 sm:$0xff] }
  0x3d   :  { %v70_v22 = vadd.f32 %v69_v13, %v64_v9  ;;  %v67_v24 = vld [vmem:[#allocation6 + $0x78] sm:$0xff]  ;;  %v75_v26 = vadd.f32 %v74_v20, %v62_v18  ;;  %p320_p13 = por %p319_p12, %p318_p11 }
  0x3e   :  { %v73_v25 = vadd.f32 %v72_v17, %v65_v10  ;;  %v78_v27 = vadd.f32 %v77_v21, %v63_v19  ;;  %v115_v36 = vld [vmem:[#allocation3] sm:$0xff] }
  0x3f   :  { %v80_v28 = vmul.f32 0.25, %v70_v22  ;;  %v76_v30 = vadd.f32 %v75_v26, %v66_v23  ;;  %p321_p0 = pnand %p320_p13, %p314_p10 }
  0x40   :  { %v81_v29 = vmul.f32 0.25, %v73_v25  ;;  %v79_v31 = vadd.f32 %v78_v27, %v67_v24 }
  0x41   :  { %v82_v33 = vmul.f32 0.25, %v76_v30 }
  0x42   :  { %v233_v32 = vpack.c.bf16 %v81_v29, %v80_v28  ;;  %v83_v34 = vmul.f32 0.25, %v79_v31 }
  0x44   :  { %234 = vmatpush3.bf16.msra.mxu0 %v233_v32  ;;  %v236_v35 = vpack.c.bf16 %v83_v34, %v82_v33 }
  0x45   :  { %235 = vmatprep.subr.bf16.mxu0 %v346_v0 }
  0x48   :  { %237 = vmatpush3.bf16.msra.mxu0 %v236_v35 }
  0x4b   :  { %230 = vmatmul.mubr.msk.f32.vlgmr.msra.gmra.mrb[0].mxu0 %vm123_vm1, %v115_v36 }
 0x11e   :  { %v193_v38 = vpop.f32.mrb[0].mxu0 }
 0x11f   :  { %v194_v39 = vadd.f32 %v214_v37, %v193_v38  ;;  %v231_v40 = vpop.f32.mrb[1].mxu0 }
 0x121   :  { %197 = vst [vmem:[#allocation9] sm:$0xff] %v194_v39 }
 0x122   :  { %324 = shalt.err (!%p321_p0)
}
 0x123   :  { %s325_s26 = scalar_lea.hbm %s421_s3, 128 }
 0x124   :  { %p326_p1 = scmp.ne.s32.totalorder %s421_s3, %s325_s26  ;;  %p329_p2 = scmp.lt.u32.totalorder %s325_s26, %s421_s3 }
 0x126   :  { %p331_p3 = pnand %p329_p2, %p326_p1 }
 0x128   :  { %334 = shalt.err (!%p331_p3)
}
 0x129   :  { %207 = dma.vmem_to_hbm [thread:$0]  %s205_s22, 128, %s421_s3, [#allocation5]  }
 0x12a   :  { %339 = dma.done.wait [#allocation5], 128  }
 0x12b   :  { %340 = vsyncadd [#allocation5], 4294967168 }
 0x12c   :  { %211 = vsyncpa [#allocation4], 1 }
 0x12d   :  { %212 = vsyncpa [#allocation7], 1 }
 0x12e   :  { %213 = vsyncpa [#allocation5], 1 }

</bundles_post_ra>
